<compile_context>
chip_gen: v7x
topology: tpu7x:2x2x1
jax: 0.10.0
libtpu: 0.0.40
codegen_flags: <defaults>
</compile_context>

<pallas_src>
import functools

import jax
import jax.numpy as jnp
from jax.experimental import pallas as pl
from jax.experimental.pallas import tpu as pltpu

DROP_RATE = 0.75   # unused in the module's forward (kept for parity)
DROP_THR = 0.9


# --------------------------------------------------------------------------- #
# Hardware-aware sizing helpers
# --------------------------------------------------------------------------- #
def _vmem_budgets():
    """Per-generation (tile_budget, vmem_limit, multi_core), bytes."""
    vmem = None
    try:
        info = pltpu.get_tpu_info()
        vmem = getattr(info, "vmem_capacity_bytes", None)
    except Exception:
        vmem = None
    if vmem is None:
        vmem = 64 * 1024 * 1024               # conservative default
    if vmem >= 100 * 1024 * 1024:
        # v5e / v6e class: 128 MiB VMEM, single TensorCore per chip.
        return 48 * 1024 * 1024, 100 * 1024 * 1024, False
    # v7x class: 64 MiB per TensorCore, two TensorCores per chip.
    tile_budget = max(8 * 1024 * 1024, min(20 * 1024 * 1024, int(vmem * 0.35)))
    vmem_limit = max(32 * 1024 * 1024, min(48 * 1024 * 1024, int(vmem * 0.75)))
    return tile_budget, vmem_limit, True


def _choose_batch_tile(B, bytes_per_batch, tile_budget, multi_core):
    """Largest divisor of B whose double-buffered working set fits the budget.

    Only 'aligned' tiles (TB == B or TB % 8 == 0, plus TB == 1) are considered
    so the squeezed (TB, HW) att/mask output blocks keep full sublane tiles.
    On dual-TensorCore chips the tile is additionally capped to keep >= 2 grid
    steps -- but only if an aligned divisor exists under the cap.
    """
    def _aligned(d):
        return d == B or d % 8 == 0

    max_tb = max(1, tile_budget // max(1, bytes_per_batch))
    if multi_core and B >= 2:
        capped = min(max_tb, B // 2)
        if any(B % d == 0 and _aligned(d) for d in range(1, capped + 1)):
            max_tb = capped
    best = 1
    for d in range(1, B + 1):
        if B % d == 0 and d <= max_tb and (_aligned(d) or d == 1):
            best = max(best, d)
    return best


def _choose_channel_tile(C, HW, isz, tile_budget):
    """Channel chunk for the two-pass fallback (sized for pass 2: x in + out,
    double-buffered).  Prefers 8-aligned chunks."""
    per_ch = 4 * HW * isz
    max_tc = max(1, tile_budget // per_ch)
    best_aligned, best_any = 0, 1
    for d in range(1, C + 1):
        if C % d == 0 and d <= max_tc:
            best_any = max(best_any, d)
            if d == C or d % 8 == 0:
                best_aligned = max(best_aligned, d)
    return best_aligned if best_aligned else best_any


# --------------------------------------------------------------------------- #
# Kernels
# --------------------------------------------------------------------------- #
def _eil_fused_kernel(x_ref, out_ref, att_ref, mask_ref):
    """Single-pass kernel: block = (TB, C, HW), full channel & spatial extent."""
    x = x_ref[...]                                               # (TB, C, HW)
    inv_c = 1.0 / x.shape[1]
    # Channel mean with f32 accumulation (no f32 copy of x kept live).
    att = jnp.sum(x, axis=1, dtype=jnp.float32) * inv_c          # (TB, HW)
    # Per-image spatial max -> threshold.
    thr = jnp.max(att, axis=-1, keepdims=True) * DROP_THR        # (TB, 1)
    keep = att < thr                                             # (TB, HW) bool
    out_ref[...] = jnp.where(keep[:, None, :], x,
                             jnp.zeros((), x.dtype)).astype(out_ref.dtype)
    att_ref[...] = att.astype(att_ref.dtype).reshape(att_ref.shape)
    mask_ref[...] = keep.astype(mask_ref.dtype).reshape(mask_ref.shape)


def _eil_att_kernel(inv_c, x_ref, att_ref, mask_ref, acc_ref):
    """Fallback pass 1: accumulate channel sum over channel chunks, finalize
    attention + drop mask at the last chunk."""
    c = pl.program_id(1)

    @pl.when(c == 0)
    def _():
        acc_ref[...] = jnp.zeros_like(acc_ref)

    acc_ref[...] += jnp.sum(x_ref[...], axis=1, keepdims=True,
                            dtype=jnp.float32)                   # (1, 1, HW)

    @pl.when(c == pl.num_programs(1) - 1)
    def _():
        att = acc_ref[...] * inv_c
        thr = jnp.max(att, axis=-1, keepdims=True) * DROP_THR
        att_ref[...] = att.astype(att_ref.dtype)
        mask_ref[...] = (att < thr).astype(mask_ref.dtype)


def _eil_apply_mask_kernel(x_ref, mask_ref, out_ref):
    """Fallback pass 2: re-stream x and apply the (1, 1, HW) mask."""
    out_ref[...] = x_ref[...] * mask_ref[...]


# --------------------------------------------------------------------------- #
# Wrappers
# --------------------------------------------------------------------------- #
def _eil_single_pass(x3, tile_budget, vmem_limit, multi_core, bytes_per_batch):
    B, C, HW = x3.shape
    isz = x3.dtype.itemsize
    TB = _choose_batch_tile(B, bytes_per_batch, tile_budget, multi_core)
    squeeze = (TB == B) or (TB % 8 == 0)

    if squeeze:
        att_shape, att_block = (B, HW), (TB, HW)
        att_map = lambda b: (b, 0)
    else:
        att_shape, att_block = (B, 1, HW), (TB, 1, HW)
        att_map = lambda b: (b, 0, 0)

    cost = pl.CostEstimate(
        flops=3 * B * C * HW,                     # sum + compare + select
        transcendentals=0,
        bytes_accessed=(2 * C + 2) * B * HW * isz,
    )
    return pl.pallas_call(
        _eil_fused_kernel,
        out_shape=(
            jax.ShapeDtypeStruct((B, C, HW), x3.dtype),   # output
            jax.ShapeDtypeStruct(att_shape, x3.dtype),    # attention
            jax.ShapeDtypeStruct(att_shape, x3.dtype),    # drop_mask
        ),
        grid_spec=pltpu.PrefetchScalarGridSpec(
            num_scalar_prefetch=0,
            grid=(pl.cdiv(B, TB),),
            in_specs=[pl.BlockSpec((TB, C, HW), lambda b: (b, 0, 0))],
            out_specs=[
                pl.BlockSpec((TB, C, HW), lambda b: (b, 0, 0)),
                pl.BlockSpec(att_block, att_map),
                pl.BlockSpec(att_block, att_map),
            ],
        ),
        compiler_params=pltpu.CompilerParams(
            dimension_semantics=("parallel",),
            vmem_limit_bytes=vmem_limit,
        ),
        cost_estimate=cost,
    )(x3)


def _eil_two_pass(x3, tile_budget, vmem_limit):
    B, C, HW = x3.shape
    isz = x3.dtype.itemsize
    TC = _choose_channel_tile(C, HW, isz, tile_budget)
    num_c = C // TC

    # ---- Pass 1: attention + mask (channel-chunked reduction) ----
    att3, mask3 = pl.pallas_call(
        functools.partial(_eil_att_kernel, 1.0 / C),
        out_shape=(
            jax.ShapeDtypeStruct((B, 1, HW), x3.dtype),
            jax.ShapeDtypeStruct((B, 1, HW), x3.dtype),
        ),
        grid_spec=pltpu.PrefetchScalarGridSpec(
            num_scalar_prefetch=0,
            grid=(B, num_c),
            in_specs=[pl.BlockSpec((1, TC, HW), lambda b, c: (b, c, 0))],
            out_specs=[
                pl.BlockSpec((1, 1, HW), lambda b, c: (b, 0, 0)),
                pl.BlockSpec((1, 1, HW), lambda b, c: (b, 0, 0)),
            ],
            scratch_shapes=[pltpu.VMEM((1, 1, HW), jnp.float32)],
        ),
        compiler_params=pltpu.CompilerParams(
            dimension_semantics=("parallel", "arbitrary"),
            vmem_limit_bytes=vmem_limit,
        ),
        cost_estimate=pl.CostEstimate(
            flops=B * C * HW + 2 * B * HW,
            transcendentals=0,
            bytes_accessed=(C + 2) * B * HW * isz,
        ),
    )(x3)

    # ---- Pass 2: re-stream x and apply the mask ----
    out3 = pl.pallas_call(
        _eil_apply_mask_kernel,
        out_shape=jax.ShapeDtypeStruct((B, C, HW), x3.dtype),
        grid_spec=pltpu.PrefetchScalarGridSpec(
            num_scalar_prefetch=0,
            grid=(B, num_c),
            in_specs=[
                pl.BlockSpec((1, TC, HW), lambda b, c: (b, c, 0)),
                pl.BlockSpec((1, 1, HW), lambda b, c: (b, 0, 0)),
            ],
            out_specs=pl.BlockSpec((1, TC, HW), lambda b, c: (b, c, 0)),
        ),
        compiler_params=pltpu.CompilerParams(
            dimension_semantics=("parallel", "parallel"),
            vmem_limit_bytes=vmem_limit,
        ),
        cost_estimate=pl.CostEstimate(
            flops=B * C * HW,
            transcendentals=0,
            bytes_accessed=(2 * C + 1) * B * HW * isz,
        ),
    )(x3, mask3)

    return out3, att3, mask3


def eil_forward(x, *, tile_budget_bytes=None):
    """EIL forward. x: (B, C, H, W). Returns (output, attention, drop_mask)."""
    B, C, H, W = x.shape
    HW = H * W
    isz = x.dtype.itemsize

    # TODO(synk): when HW < 128, fold channel groups into the lane axis
    # (pltpu.roll-based repack) so vregs are lane-dense; not needed for the
    # shapes exercised here (HW >= 128).
    x3 = x.reshape(B, C, HW)

    tile_budget, vmem_limit, multi_core = _vmem_budgets()
    if tile_budget_bytes is not None:
        tile_budget = tile_budget_bytes

    # Double-buffered working set of ONE image in the fused kernel:
    #   x block + out block (C*HW each) + att + mask (HW each).
    bytes_per_batch = 2 * (2 * C * HW + 2 * HW) * isz

    if bytes_per_batch <= tile_budget:
        out3, att, mask = _eil_single_pass(
            x3, tile_budget, vmem_limit, multi_core, bytes_per_batch)
    else:
        # A single image does not fit the VMEM budget: two-pass fallback.
        out3, att, mask = _eil_two_pass(x3, tile_budget, vmem_limit)

    return (out3.reshape(B, C, H, W),
            att.reshape(B, 1, H, W),
            mask.reshape(B, 1, H, W))


# --------------------------------------------------------------------------- #
# Reference + self-test
# --------------------------------------------------------------------------- #
def eil_reference(x):
    """Pure-JAX reference mirroring the PyTorch forward."""
    C = x.shape[1]
    att_f32 = jnp.sum(x.astype(jnp.float32), axis=1, keepdims=True) * (1.0 / C)
    max_val = jnp.max(att_f32, axis=(2, 3), keepdims=True)       # (B,1,1,1)
    mask = (att_f32 < max_val * DROP_THR).astype(x.dtype)
    att = att_f32.astype(x.dtype)
    return x * mask, att, mask


def _check(x, **kw):
    out, att, mask = eil_forward(x, **kw)
    out = jax.block_until_ready(out)
    ref_out, ref_att, ref_mask = eil_reference(x)
    assert jnp.allclose(out, ref_out, atol=1e-5, rtol=1e-5)
    assert jnp.allclose(att, ref_att, atol=1e-5, rtol=1e-5)
    assert jnp.allclose(mask, ref_mask)


if __name__ == "__main__":
    key = jax.random.PRNGKey(0)
    k1, k2 = jax.random.split(key)

    # Primary (fused single-pass) path.
    x = jax.random.normal(k1, (2, 4, 16, 16), dtype=jnp.float32)
    _check(x)

    # Force the two-pass large-feature-map fallback with a tiny tile budget.
    x2 = jax.random.normal(k2, (2, 16, 8, 16), dtype=jnp.float32)
    _check(x2, tile_budget_bytes=16 * 1024)

    print("KERNEL_OK")
</pallas_src>

<mosaic_0001>
module attributes {stable_mosaic.version = 11 : i64} {
  func.func @_eil_fused_kernel(%arg0: i32, %arg1: memref<2x4x256xf32, #tpu.memory_space<vmem>>, %arg2: memref<2x4x256xf32, #tpu.memory_space<vmem>>, %arg3: memref<2x256xf32, #tpu.memory_space<vmem>>, %arg4: memref<2x256xf32, #tpu.memory_space<vmem>>) attributes {dimension_semantics = [#tpu.dimension_semantics<parallel>], iteration_bounds = array<i64: 1>, scalar_prefetch = 0 : i64, scratch_operands = 0 : i64, tpu.core_type = #tpu.core_type<tc>, window_params = [{transform_indices = @transform_0, window_bounds = array<i64: 2, 4, 256>}, {transform_indices = @transform_1, window_bounds = array<i64: 2, 4, 256>}, {transform_indices = @transform_2, window_bounds = array<i64: 2, 256>}, {transform_indices = @transform_3, window_bounds = array<i64: 2, 256>}]} {
    %c0 = arith.constant 0 : index
    %c0_0 = arith.constant 0 : index
    %c0_1 = arith.constant 0 : index
    %0 = vector.load %arg1[%c0, %c0_0, %c0_1] : memref<2x4x256xf32, #tpu.memory_space<vmem>>, vector<2x4x256xf32>
    %cst = arith.constant dense<0.000000e+00> : vector<2x256xf32>
    %1 = vector.multi_reduction <add>, %0, %cst [1] : vector<2x4x256xf32> to vector<2x256xf32>
    %cst_2 = arith.constant 2.500000e-01 : f32
    %2 = vector.broadcast %cst_2 : f32 to vector<2x256xf32>
    %3 = arith.mulf %1, %2 : vector<2x256xf32>
    %cst_3 = arith.constant dense<0xFF800000> : vector<2xf32>
    %4 = vector.multi_reduction <maximumf>, %3, %cst_3 [1] : vector<2x256xf32> to vector<2xf32>
    %5 = vector.shape_cast %4 : vector<2xf32> to vector<2x1xf32>
    %cst_4 = arith.constant 0.899999976 : f32
    %6 = vector.broadcast %cst_4 : f32 to vector<2x1xf32>
    %7 = arith.mulf %5, %6 : vector<2x1xf32>
    %8 = vector.broadcast %7 : vector<2x1xf32> to vector<2x256xf32>
    %9 = arith.cmpf olt, %3, %8 : vector<2x256xf32>
    %10 = vector.shape_cast %9 : vector<2x256xi1> to vector<2x1x256xi1>
    %cst_5 = arith.constant 0.000000e+00 : f32
    %11 = vector.shape_cast %10 : vector<2x1x256xi1> to vector<2x1x256xi1>
    %12 = vector.broadcast %11 : vector<2x1x256xi1> to vector<2x4x256xi1>
    %13 = vector.broadcast %cst_5 : f32 to vector<2x4x256xf32>
    %14 = arith.select %12, %0, %13 : vector<2x4x256xi1>, vector<2x4x256xf32>
    %c0_6 = arith.constant 0 : index
    %c0_7 = arith.constant 0 : index
    %c0_8 = arith.constant 0 : index
    %15 = vector.load %arg2[%c0_6, %c0_7, %c0_8] : memref<2x4x256xf32, #tpu.memory_space<vmem>>, vector<2x4x256xf32>
    tpu.vector_store %arg2[%c0_6, %c0_7, %c0_8], %14 {strides = array<i32>} : memref<2x4x256xf32, #tpu.memory_space<vmem>>, vector<2x4x256xf32>,
    %c0_9 = arith.constant 0 : index
    %c0_10 = arith.constant 0 : index
    %16 = vector.load %arg3[%c0_9, %c0_10] : memref<2x256xf32, #tpu.memory_space<vmem>>, vector<2x256xf32>
    tpu.vector_store %arg3[%c0_9, %c0_10], %3 {strides = array<i32>} : memref<2x256xf32, #tpu.memory_space<vmem>>, vector<2x256xf32>,
    %17 = arith.extui %9 : vector<2x256xi1> to vector<2x256xi32>
    %18 = arith.sitofp %17 : vector<2x256xi32> to vector<2x256xf32>
    %c0_11 = arith.constant 0 : index
    %c0_12 = arith.constant 0 : index
    %19 = vector.load %arg4[%c0_11, %c0_12] : memref<2x256xf32, #tpu.memory_space<vmem>>, vector<2x256xf32>
    tpu.vector_store %arg4[%c0_11, %c0_12], %18 {strides = array<i32>} : memref<2x256xf32, #tpu.memory_space<vmem>>, vector<2x256xf32>,
    return
  }
  func.func @transform_0(%arg0: i32) -> (i32, i32, i32) {
    %c0_i32 = arith.constant 0 : i32
    %c0_i32_0 = arith.constant 0 : i32
    %c0_i32_1 = arith.constant 0 : i32
    return %arg0, %c0_i32, %c0_i32_0 : i32, i32, i32
  }
  func.func @transform_1(%arg0: i32) -> (i32, i32, i32) {
    %c0_i32 = arith.constant 0 : i32
    %c0_i32_0 = arith.constant 0 : i32
    %c0_i32_1 = arith.constant 0 : i32
    return %arg0, %c0_i32, %c0_i32_0 : i32, i32, i32
  }
  func.func @transform_2(%arg0: i32) -> (i32, i32) {
    %c0_i32 = arith.constant 0 : i32
    %c0_i32_0 = arith.constant 0 : i32
    return %arg0, %c0_i32 : i32, i32
  }
  func.func @transform_3(%arg0: i32) -> (i32, i32) {
    %c0_i32 = arith.constant 0 : i32
    %c0_i32_0 = arith.constant 0 : i32
    return %arg0, %c0_i32 : i32, i32
  }
}

</mosaic_0001>

<bundles_post_ra>
// kernel: tpu_custom_call.1
= control target key start
LH: loop header
LB: loop body
LE: loop exit
PB: predicated region body
PF: predicated region fallthrough
CT: control target
= control target key end

     0   :  { %9 = vsyncpa [#allocation3], 0  ;;  %s472_s0 = inlined_call_operand.hbm [shape: f32[2,4,256], index: 0, kind: input, shape index: {}]   ;;  %s473_s1 = inlined_call_operand.hbm [shape: f32[2,4,256], index: 1, kind: output, shape index: {0}]   ;;  %s474_s2 = inlined_call_operand.hbm [shape: f32[2,256], index: 2, kind: output, shape index: {1}]   ;;  %s475_s3 = inlined_call_operand.hbm [shape: f32[2,256], index: 3, kind: output, shape index: {2}]  }
   0x1   :  { %10 = vsyncpa [#allocation4], 0 }
   0x2   :  { %11 = vsyncpa [#allocation7], 0  ;;  %s346_s12 = smov [#allocation2]   ;;  %s252_s16 = scalar_lea.hbm %s472_s0, 256 }
   0x3   :  { %s17_s13 = sshll.u32 %s346_s12, 4  ;;  %p253_p0 = scmp.ne.s32.totalorder %s472_s0, %s252_s16  ;;  %s18_s13 = int_to_ptr.vmem [resolvable:$true] %s17_s13 }
   0x4   :  { %p256_p1 = scmp.lt.u32.totalorder %s252_s16, %s472_s0 }
   0x6   :  { %p258_p2 = pnand %p256_p1, %p253_p0 }
   0x8   :  { %261 = shalt.err (!%p258_p2)
}
   0x9   :  { %s262_s21 = scalar_lea.vmem %s18_s13, 256  ;;  %p267_p4 = scmp.lt.s32.totalorder %s18_s13, %s18_s13 }
   0xa   :  { %p263_p3 = scmp.ne.s32.totalorder %s18_s13, %s262_s21  ;;  %p268_p5 = scmp.lt.s32.totalorder %s262_s21, %s262_s21 }
   0xc   :  { %p269_p6 = por %p268_p5, %p267_p4 }
   0xe   :  { %p270_p7 = pnand %p269_p6, %p263_p3 }
  0x10   :  { %273 = shalt.err (!%p270_p7)
}
  0x11   :  { %s347_s22 = smov 128   ;;  %s348_s23 = smov 8  }
  0x12   :  { %23 = dma.hbm_to_vmem [thread:$0]  %s472_s0, 256, %s18_s13, [#allocation3], %s347_s22, %s347_s22, %s348_s23  }
  0x13   :  { %340 = dma.done.wait [#allocation3], 256  }
  0x14   :  { %341 = vsyncadd [#allocation3], 4294967040  ;;  %vm35_vm0 = vcmask 1043456   ;;  %v390_v0 = vld [vmem:[#allocation2] sm:$0xff]  ;;  %v392_v1 = vld [vmem:[#allocation2 + $0x8] sm:$0xff]  ;;  %vm72_vm1 = vcmask 1041409   ;;  %v96_v43 = vlaneseq }
  0x15   :  { %v396_v2 = vcombine.high %v390_v0, %v390_v0  ;;  %v400_v3 = vcombine.high %v392_v1, %v392_v1  ;;  %v36_v4 = vsel %vm35_vm0, %v390_v0, 0.0  ;;  %v50_v5 = vsel %vm35_vm0, %v392_v1, 0.0  ;;  %s350_s0 = smov [#allocation6]  }
  0x16   :  { %v37_v6 = vrot.slane %v36_v4, 4  ;;  %v51_v7 = vrot.slane %v50_v5, 4  ;;  %vm77_vm2 = vcmask 1041408   ;;  %v349_v41 = vmov 1983009808   ;;  %s211_s26 = sshll.u32 %s350_s0, 4  ;;  %s212_s26 = int_to_ptr.vmem [resolvable:$true] %s211_s26 }
  0x17   :  { %v43_v8 = vsel %vm35_vm0, %v396_v2, 0.0  ;;  %v57_v9 = vsel %vm35_vm0, %v400_v3, 0.0  ;;  %v132_v42 = vunpack.c.l.s4 %v349_v41  ;;  %v97_v45 = vshrl.u32 %v96_v43, 7  ;;  %s274_s27 = scalar_lea.vmem %s212_s26, 64  ;;  %p279_p9 = scmp.lt.s32.totalorder %s212_s26, %s212_s26 }
  0x18   :  { %v38_v10 = vadd.f32 %v37_v6, %v36_v4  ;;  %v44_v11 = vrot.slane %v43_v8, 4  ;;  %v52_v12 = vadd.f32 %v51_v7, %v50_v5  ;;  %v58_v13 = vrot.slane %v57_v9, 4  ;;  %p275_p8 = scmp.ne.s32.totalorder %s212_s26, %s274_s27  ;;  %p280_p10 = scmp.lt.s32.totalorder %s274_s27, %s274_s27 }
  0x19   :  { %v133_v44 = vunpack.c.0.s8 %v132_v42  ;;  %vm152_vm3 = vcmask 1043459   ;;  %vm154_vm4 = vcmask 1045509   ;;  %vm156_vm5 = vcmask 1047559  }
  0x1a   :  { %v39_v14 = vrot.slane %v38_v10, 2  ;;  %v45_v15 = vadd.f32 %v44_v11, %v43_v8  ;;  %v53_v16 = vrot.slane %v52_v12, 2  ;;  %v59_v17 = vadd.f32 %v58_v13, %v57_v9  ;;  %p281_p11 = por %p280_p10, %p279_p9 }
  0x1b   :  { %v408_v47 = vsub.s32 %v133_v44, %v97_v45 }
  0x1c   :  { %v40_v18 = vadd.f32 %v39_v14, %v38_v10  ;;  %v46_v19 = vrot.slane %v45_v15, 2  ;;  %v54_v20 = vadd.f32 %v53_v16, %v52_v12  ;;  %v60_v21 = vrot.slane %v59_v17, 2  ;;  %p282_p12 = pnand %p281_p11, %p275_p8 }
  0x1e   :  { %v41_v22 = vrot.slane %v40_v18, 1  ;;  %v47_v23 = vadd.f32 %v46_v19, %v45_v15  ;;  %v55_v24 = vrot.slane %v54_v20, 1  ;;  %v61_v25 = vadd.f32 %v60_v21, %v59_v17 }
  0x20   :  { %v42_v26 = vadd.f32 %v41_v22, %v40_v18  ;;  %v48_v27 = vrot.slane %v47_v23, 1  ;;  %v56_v28 = vadd.f32 %v55_v24, %v54_v20  ;;  %v62_v29 = vrot.slane %v61_v25, 1 }
  0x22   :  { %v49_v30 = vadd.f32 %v48_v27, %v47_v23  ;;  %v63_v31 = vadd.f32 %v62_v29, %v61_v25  ;;  %v64_v32 = vmul.f32 0.25, %v42_v26  ;;  %v66_v33 = vmul.f32 0.25, %v56_v28 }
  0x24   :  { %v65_v34 = vmul.f32 0.25, %v49_v30  ;;  %v67_v35 = vmul.f32 0.25, %v63_v31  ;;  %v73_v36 = vsel %vm72_vm1, %v66_v33, %v64_v32 }
  0x25   :  { %v78_v37 = vsel %vm77_vm2, %v73_v36, -inf }
  0x26   :  { %v74_v38 = vsel %vm72_vm1, %v67_v35, %v65_v34  ;;  %v130_v46 = vcombine.low %v64_v32, %v65_v34  ;;  %v138_v48 = vcombine.low %v66_v33, %v67_v35 }
  0x27   :  { %v79_v39 = vsel %vm77_vm2, %v74_v38, -inf }
  0x28   :  { %v80_v40 = vmax.f32 %v78_v37, %v79_v39  ;;  %v137_v49 = vrot.slane %v130_v46, %v408_v47  ;;  %v145_v50 = vrot.slane %v138_v48, %v408_v47 }
  0x2a   :  { %81 = vmax.xlane.f32.xlu0 %v80_v40  ;;  %v150_v51 = vrot.slane %v145_v50, 7 }
  0x2c   :  { %v151_v52 = vsel %vm72_vm1, %v150_v51, %v137_v49 }
  0x2d   :  { %v153_v53 = vsel %vm152_vm3, %v150_v51, %v151_v52 }
  0x2e   :  { %v155_v54 = vsel %vm154_vm4, %v150_v51, %v153_v53 }
  0x2f   :  { %v157_v55 = vsel %vm156_vm5, %v150_v51, %v155_v54 }
  0x30   :  { %159 = vst [vmem:[#allocation6] sm:$0xf] %v157_v55 }
  0x31   :  { %285 = shalt.err (!%p282_p12)
}
  0x32   :  { %s286_s30 = scalar_lea.hbm %s474_s2, 64 }
  0x33   :  { %p287_p13 = scmp.ne.s32.totalorder %s474_s2, %s286_s30  ;;  %p290_p0 = scmp.lt.u32.totalorder %s286_s30, %s474_s2 }
  0x35   :  { %p292_p1 = pnand %p290_p0, %p287_p13 }
  0x37   :  { %295 = shalt.err (!%p292_p1)
}
  0x38   :  { %214 = dma.vmem_to_hbm [thread:$0]  %s212_s26, 64, %s474_s2, [#allocation7]   ;;  %v98_v58 = vsub.s32 0, %v97_v45  ;;  %v351_v60 = vmov 0   ;;  %v352_v63 = vmov 0.0  }
  0x39   :  { %s353_s2 = smov [#allocation5]   ;;  %s354_s11 = smov [#allocation8]  }
  0x3a   :  { %s198_s10 = sshll.u32 %s353_s2, 4  ;;  %s221_s12 = sshll.u32 %s354_s11, 4  ;;  %s199_s10 = int_to_ptr.vmem [resolvable:$true] %s198_s10  ;;  %s436_s12 = int_to_ptr.vmem [resolvable:$true] %s221_s12 }
  0x3b   :  { %s296_s13 = scalar_lea.vmem %s199_s10, 256  ;;  %p301_p3 = scmp.lt.s32.totalorder %s199_s10, %s199_s10 }
  0x3c   :  { %p297_p2 = scmp.ne.s32.totalorder %s199_s10, %s296_s13  ;;  %p302_p4 = scmp.lt.s32.totalorder %s296_s13, %s296_s13 }
  0x3e   :  { %p303_p5 = por %p302_p4, %p301_p3 }
  0x40   :  { %p304_p6 = pnand %p303_p5, %p297_p2 }
  0xb7   :  { %v82_v56 = vpop.xlane.xlu0 %81 }
  0xb8   :  { %v83_v57 = vmul.f32 0.9, %v82_v56 }
  0xba   :  { %v85_v59 = vrot.slane %v83_v57, 1  ;;  %vm88_vm6 = vcmp.lt.f32.partialorder %v64_v32, %v83_v57  ;;  %vm89_vm7 = vcmp.lt.f32.partialorder %v65_v34, %v83_v57 }
  0xbb   :  { %v92_v61 = vsel %vm88_vm6, 1, %v351_v60  ;;  %v93_v62 = vsel %vm89_vm7, 1, %v351_v60  ;;  %v237_v4 = vsel %vm88_vm6, 1.0, %v352_v63  ;;  %v238_v5 = vsel %vm89_vm7, 1.0, %v352_v63 }
  0xbc   :  { %vm90_vm8 = vcmp.lt.f32.partialorder %v66_v33, %v85_v59  ;;  %vm91_vm9 = vcmp.lt.f32.partialorder %v67_v35, %v85_v59  ;;  %v99_v6 = vrot.slane %v92_v61, %v98_v58  ;;  %v103_v7 = vrot.slane %v93_v62, %v98_v58 }
  0xbd   :  { %v94_v8 = vsel %vm90_vm8, 1, %v351_v60  ;;  %v95_v9 = vsel %vm91_vm9, 1, %v351_v60  ;;  %v239_v10 = vsel %vm90_vm8, 1.0, %v352_v63  ;;  %v240_v11 = vsel %vm91_vm9, 1.0, %v352_v63 }
  0xbe   :  { %vm112_vm10 = vcmp.eq.s32.totalorder %v99_v6, 1  ;;  %vm113_vm11 = vcmp.eq.s32.totalorder %v103_v7, 1  ;;  %v168_v12 = vcombine.low %v237_v4, %v238_v5  ;;  %v176_v13 = vcombine.low %v239_v10, %v240_v11 }
  0xbf   :  { %v107_v14 = vrot.slane %v94_v8, %v98_v58  ;;  %v111_v15 = vrot.slane %v95_v9, %v98_v58  ;;  %v116_v16 = vsel %vm112_vm10, %v390_v0, 0.0  ;;  %v117_v17 = vsel %vm113_vm11, %v396_v2, 0.0 }
  0xc0   :  { %v183_v18 = vrot.slane %v176_v13, %v408_v47  ;;  %v124_v19 = vcombine.low %v116_v16, %v117_v17  ;;  %v175_v20 = vrot.slane %v168_v12, %v408_v47 }
  0xc1   :  { %vm114_vm12 = vcmp.eq.s32.totalorder %v107_v14, 1  ;;  %vm115_vm13 = vcmp.eq.s32.totalorder %v111_v15, 1 }
  0xc2   :  { %v186_v21 = vrot.slane %v183_v18, 7  ;;  %v118_v22 = vsel %vm114_vm12, %v392_v1, 0.0  ;;  %v119_v23 = vsel %vm115_vm13, %v400_v3, 0.0  ;;  %128 = vst [vmem:[#allocation5] sm:$0xff] %v124_v19 }
  0xc3   :  { %v125_v0 = vcombine.low %v118_v22, %v119_v23 }
  0xc4   :  { %v187_v2 = vsel %vm72_vm1, %v186_v21, %v175_v20 }
  0xc5   :  { %129 = vst [vmem:[#allocation5 + $0x8] sm:$0xff] %v125_v0  ;;  %v188_v24 = vsel %vm152_vm3, %v186_v21, %v187_v2 }
  0xc6   :  { %307 = shalt.err (!%p304_p6)
}
  0xc7   :  { %s308_s16 = scalar_lea.hbm %s473_s1, 256 }
  0xc8   :  { %p309_p7 = scmp.ne.s32.totalorder %s473_s1, %s308_s16  ;;  %p312_p8 = scmp.lt.u32.totalorder %s308_s16, %s473_s1 }
  0xca   :  { %p314_p9 = pnand %p312_p8, %p309_p7 }
  0xcc   :  { %317 = shalt.err (!%p314_p9)
}
  0xcd   :  { %204 = dma.vmem_to_hbm [thread:$0]  %s199_s10, 256, %s473_s1, [#allocation4], %s347_s22, %s347_s22, %s348_s23   ;;  %v189_v1 = vsel %vm154_vm4, %v186_v21, %v188_v24 }
  0xce   :  { %v190_v3 = vsel %vm156_vm5, %v186_v21, %v189_v1  ;;  %s318_s25 = scalar_lea.vmem %s436_s12, 64  ;;  %p323_p11 = scmp.lt.s32.totalorder %s436_s12, %s436_s12 }
  0xcf   :  { %192 = vst [vmem:[#allocation8] sm:$0xf] %v190_v3  ;;  %p319_p10 = scmp.ne.s32.totalorder %s436_s12, %s318_s25  ;;  %p324_p12 = scmp.lt.s32.totalorder %s318_s25, %s318_s25 }
  0xd1   :  { %p325_p13 = por %p324_p12, %p323_p11 }
  0xd3   :  { %p326_p0 = pnand %p325_p13, %p319_p10 }
  0xd5   :  { %329 = shalt.err (!%p326_p0)
}
  0xd6   :  { %s330_s27 = scalar_lea.hbm %s475_s3, 64 }
  0xd7   :  { %p331_p1 = scmp.ne.s32.totalorder %s475_s3, %s330_s27  ;;  %p334_p2 = scmp.lt.u32.totalorder %s330_s27, %s475_s3 }
  0xd9   :  { %p336_p3 = pnand %p334_p2, %p331_p1 }
  0xdb   :  { %339 = shalt.err (!%p336_p3)
}
  0xdc   :  { %224 = dma.vmem_to_hbm [thread:$0]  %s436_s12, 64, %s475_s3, [#allocation7]  }
  0xdd   :  { %342 = dma.done.wait [#allocation4], 256  }
  0xde   :  { %343 = vsyncadd [#allocation4], 4294967040 }
  0xdf   :  { %344 = dma.done.wait [#allocation7], 128  }
  0xe0   :  { %345 = vsyncadd [#allocation7], 4294967168 }
  0xe1   :  { %234 = vsyncpa [#allocation3], 1 }
  0xe2   :  { %235 = vsyncpa [#allocation4], 1 }
  0xe3   :  { %236 = vsyncpa [#allocation7], 1 }

</bundles_post_ra>
